<compile_context>
chip_gen: v6e
topology: v6e:2x2x1
jax: 0.10.0
libtpu: 0.0.40
codegen_flags: <defaults>
</compile_context>

<pallas_src>
import functools

import jax
import jax.numpy as jnp
from jax.experimental import pallas as pl
from jax.experimental.pallas import tpu as pltpu


def _mlp_kernel(x_ref, w1_ref, b1_ref, w2_ref, b2_ref, w3_ref, b3_ref, o_ref):
    # 3 matmuls on the MXU (f32 accumulate); bias-add/ReLU on the VPU in f32
    # (v5e has no bf16 VALU), downcast fused into the same pass so the
    # inter-layer temporaries are stored once, in the matmul operand dtype.
    x = x_ref[...].astype(w1_ref.dtype)                                # f32 -> bf16 in-kernel
    h1 = jnp.dot(x, w1_ref[...], preferred_element_type=jnp.float32)
    h1 = jnp.maximum(h1 + b1_ref[...], 0.0).astype(w2_ref.dtype)       # fused bias+ReLU+cast
    h2 = jnp.dot(h1, w2_ref[...], preferred_element_type=jnp.float32)
    h2 = jnp.maximum(h2 + b2_ref[...], 0.0).astype(w3_ref.dtype)       # fused bias+ReLU+cast
    y = jnp.dot(h2, w3_ref[...], preferred_element_type=jnp.float32)
    o_ref[...] = (y + b3_ref[...]).astype(o_ref.dtype)                 # narrow (tb, O) store


def _pick_batch_tile(b_pad, d, o, h1, h2p, operand_dtype,
                     budget_bytes=24 * 1024 * 1024):
    """Largest sublane-aligned batch tile whose double-buffered f32 x / f32 out
    buffers plus resident params fit a conservative VMEM budget (valid on
    v5e/v6e/v7x).  If the batch exceeds the tile, split into ceil-divided steps
    of equal (8-aligned) size so the grid stays coarse and megacore-balanced."""
    wb = jnp.dtype(operand_dtype).itemsize
    w_bytes = (d * h1 + h1 * h2p + h2p * o) * wb + (h1 + h2p + o) * 4
    per_row = 2 * d * 4 + 2 * o * 4                  # double-buffered x(f32) + out(f32)
    tb_max = 8
    for tb in (8192, 4096, 2048, 1024, 512, 256, 128, 64, 32, 16, 8):
        if tb * per_row + 2 * w_bytes <= budget_bytes:
            tb_max = tb
            break
    if b_pad <= tb_max:
        return b_pad                                  # single grid step
    n_steps = -(-b_pad // tb_max)                     # >= 2
    return ((-(-b_pad // n_steps) + 7) // 8) * 8      # equalized, 8-aligned, <= tb_max


@functools.partial(jax.jit, static_argnames=("batch_tile", "compute_dtype"))
def cpnet_forward(x, params, *, batch_tile=None, compute_dtype=jnp.bfloat16):
    """Fused CPNet (MLP) forward via a single pallas_call.

    x: (B, input_dim) float32
    params: dict with w1 (D,128), b1 (1,128), w2 (128,64), b2 (1,64),
            w3 (64,O), b3 (1,O)
    compute_dtype: matmul operand dtype (bf16 halves weight bytes and runs the
                   MXU at native rate; accumulation is always f32).  x itself
                   is read at f32 and cast inside the kernel.
    """
    w1, b1, w2, b2, w3, b3 = (params[k] for k in ("w1", "b1", "w2", "b2", "w3", "b3"))
    B, D = x.shape
    H1 = w1.shape[1]
    H2 = w2.shape[1]
    O = w3.shape[1]

    # Pad the hidden-2 width to a lane-dense 128 so h2 is an unmasked (tb,128)
    # tile and the third matmul has K=128.  Padded weights/bias are zeros, so
    # the extra h2 columns are ReLU(0)=0 and contribute nothing.
    H2_pad = max(128, ((H2 + 127) // 128) * 128)
    if H2_pad != H2:
        w2 = jnp.pad(w2, ((0, 0), (0, H2_pad - H2)))
        b2 = jnp.pad(b2, ((0, 0), (0, H2_pad - H2)))
        w3 = jnp.pad(w3, ((0, H2_pad - H2), (0, 0)))

    # Matmul weights in compute_dtype; biases stay f32 (added post-accumulation).
    w1c, w2c, w3c = (w.astype(compute_dtype) for w in (w1, w2, w3))
    b1f, b2f, b3f = (b.astype(jnp.float32) for b in (b1, b2, b3))

    # Tile the batch: pick the tile, then pad the batch up to a multiple of it
    # (padded zero rows are computed and sliced off; far cheaper than a fine grid).
    B_pad = ((B + 7) // 8) * 8
    tb = batch_tile if batch_tile is not None else _pick_batch_tile(
        B_pad, D, O, H1, H2_pad, compute_dtype)
    tb = ((tb + 7) // 8) * 8
    n_steps = -(-B_pad // tb)
    B_grid = n_steps * tb
    if B_grid != B:
        x = jnp.pad(x, ((0, B_grid - B), (0, 0)))

    resident = lambda shape: pl.BlockSpec(shape, lambda i: (0,) * len(shape))

    out = pl.pallas_call(
        _mlp_kernel,
        out_shape=jax.ShapeDtypeStruct((B_grid, O), jnp.float32),
        grid_spec=pltpu.PrefetchScalarGridSpec(
            num_scalar_prefetch=0,
            grid=(n_steps,),
            in_specs=[
                pl.BlockSpec((tb, D), lambda i: (i, 0)),        # x tile (only per-step DMA in)
                resident((D, H1)), resident((1, H1)),           # layer 1 params (VMEM-resident)
                resident((H1, H2_pad)), resident((1, H2_pad)),  # layer 2 params (padded to 128)
                resident((H2_pad, O)), resident((1, O)),        # layer 3 params
            ],
            out_specs=pl.BlockSpec((tb, O), lambda i: (i, 0)),  # narrow output: O f32/row to HBM
        ),
        compiler_params=pltpu.CompilerParams(
            dimension_semantics=("parallel",),          # megacore-shardable on v7x
            vmem_limit_bytes=32 * 1024 * 1024,          # fits v7x's 64 MiB physical VMEM
        ),
    )(x, w1c, b1f, w2c, b2f, w3c, b3f)

    return out[:B, :]


def init_cpnet_params(key, input_dim, output_dim, dtype=jnp.float32):
    """Deterministic init matching PyTorch nn.Linear default (uniform +-1/sqrt(fan_in))."""
    def linear(k, fan_in, fan_out):
        kw, kb = jax.random.split(k)
        bound = 1.0 / jnp.sqrt(jnp.asarray(fan_in, dtype))
        w = jax.random.uniform(kw, (fan_in, fan_out), dtype, -bound, bound)
        b = jax.random.uniform(kb, (1, fan_out), dtype, -bound, bound)
        return w, b

    k1, k2, k3 = jax.random.split(key, 3)
    w1, b1 = linear(k1, input_dim, 128)
    w2, b2 = linear(k2, 128, 64)
    w3, b3 = linear(k3, 64, output_dim)
    return {"w1": w1, "b1": b1, "w2": w2, "b2": b2, "w3": w3, "b3": b3}


def cpnet_reference(x, p):
    h1 = jnp.maximum(x @ p["w1"] + p["b1"], 0.0)
    h2 = jnp.maximum(h1 @ p["w2"] + p["b2"], 0.0)
    return h2 @ p["w3"] + p["b3"]


if __name__ == "__main__":
    key = jax.random.PRNGKey(0)
    k_params, k_x, k_x2 = jax.random.split(key, 3)

    batch = 8
    input_dim = 32
    output_dim = 4

    params = init_cpnet_params(k_params, input_dim, output_dim)
    x = jax.random.normal(k_x, (batch, input_dim), jnp.float32)
    ref = cpnet_reference(x, params)

    # 1) Exact-semantics check: f32 operands must match the reference tightly.
    out_f32 = jax.block_until_ready(cpnet_forward(x, params, compute_dtype=jnp.float32))
    assert out_f32.shape == (batch, output_dim), out_f32.shape
    assert jnp.allclose(out_f32, ref, atol=1e-5, rtol=1e-5), "f32 kernel mismatch vs reference"

    # 2) Default fast path: bf16 operands (cast in-kernel), f32 accumulation.
    out_bf16 = jax.block_until_ready(cpnet_forward(x, params))
    assert out_bf16.shape == (batch, output_dim), out_bf16.shape
    assert jnp.allclose(out_bf16, ref, atol=5e-2, rtol=5e-2), "bf16 kernel mismatch vs reference"

    # 3) Non-power-of-two batch + forced multi-tile grid: exercises the
    #    pad-to-tile-multiple path and pipelined / megacore-shardable grid.
    batch_big = 1000
    x_big = jax.random.normal(k_x2, (batch_big, input_dim), jnp.float32)
    ref_big = cpnet_reference(x_big, params)
    out_big = jax.block_until_ready(cpnet_forward(x_big, params, batch_tile=256))
    assert out_big.shape == (batch_big, output_dim), out_big.shape
    assert jnp.allclose(out_big, ref_big, atol=5e-2, rtol=5e-2), "tiled bf16 kernel mismatch"

    # 4) Same non-power-of-two batch through the automatic tile picker.
    out_auto = jax.block_until_ready(cpnet_forward(x_big, params))
    assert out_auto.shape == (batch_big, output_dim), out_auto.shape
    assert jnp.allclose(out_auto, ref_big, atol=5e-2, rtol=5e-2), "auto-tiled kernel mismatch"

    print("KERNEL_OK")
</pallas_src>

<mosaic_0001>
module attributes {stable_mosaic.version = 11 : i64} {
  func.func @_mlp_kernel(%arg0: i32, %arg1: memref<8x32xf32, #tpu.memory_space<vmem>>, %arg2: memref<32x128xf32, #tpu.memory_space<vmem>>, %arg3: memref<1x128xf32, #tpu.memory_space<vmem>>, %arg4: memref<128x128xf32, #tpu.memory_space<vmem>>, %arg5: memref<1x128xf32, #tpu.memory_space<vmem>>, %arg6: memref<128x4xf32, #tpu.memory_space<vmem>>, %arg7: memref<1x4xf32, #tpu.memory_space<vmem>>, %arg8: memref<8x4xf32, #tpu.memory_space<vmem>>) attributes {dimension_semantics = [#tpu.dimension_semantics<parallel>], iteration_bounds = array<i64: 1>, scalar_prefetch = 0 : i64, scratch_operands = 0 : i64, tpu.core_type = #tpu.core_type<tc>, window_params = [{transform_indices = @transform_0, window_bounds = array<i64: 8, 32>}, {pipeline_mode = #tpu.pipeline_mode<synchronous>, transform_indices = @transform_1, window_bounds = array<i64: 32, 128>}, {pipeline_mode = #tpu.pipeline_mode<synchronous>, transform_indices = @transform_2, window_bounds = array<i64: 1, 128>}, {pipeline_mode = #tpu.pipeline_mode<synchronous>, transform_indices = @transform_3, window_bounds = array<i64: 128, 128>}, {pipeline_mode = #tpu.pipeline_mode<synchronous>, transform_indices = @transform_4, window_bounds = array<i64: 1, 128>}, {pipeline_mode = #tpu.pipeline_mode<synchronous>, transform_indices = @transform_5, window_bounds = array<i64: 128, 4>}, {pipeline_mode = #tpu.pipeline_mode<synchronous>, transform_indices = @transform_6, window_bounds = array<i64: 1, 4>}, {transform_indices = @transform_7, window_bounds = array<i64: 8, 4>}]} {
    %c0 = arith.constant 0 : index
    %c0_0 = arith.constant 0 : index
    %0 = vector.load %arg1[%c0, %c0_0] : memref<8x32xf32, #tpu.memory_space<vmem>>, vector<8x32xf32>
    %c0_1 = arith.constant 0 : index
    %c0_2 = arith.constant 0 : index
    %1 = vector.load %arg2[%c0_1, %c0_2] : memref<32x128xf32, #tpu.memory_space<vmem>>, vector<32x128xf32>
    %cst = arith.constant dense<0.000000e+00> : vector<8x128xf32>
    %2 = tpu.matmul %0, %1, %cst {dimension_numbers = #tpu.dot_dimension_numbers<[1], [0], [0], [1], [0, 0, 1, 1], [], []>} : vector<8x32xf32>, vector<32x128xf32>, vector<8x128xf32> -> vector<8x128xf32>
    %c0_3 = arith.constant 0 : index
    %c0_4 = arith.constant 0 : index
    %3 = vector.load %arg3[%c0_3, %c0_4] : memref<1x128xf32, #tpu.memory_space<vmem>>, vector<1x128xf32>
    %4 = vector.broadcast %3 : vector<1x128xf32> to vector<8x128xf32>
    %5 = arith.addf %2, %4 : vector<8x128xf32>
    %cst_5 = arith.constant 0.000000e+00 : f32
    %6 = vector.broadcast %cst_5 : f32 to vector<8x128xf32>
    %7 = arith.maximumf %5, %6 : vector<8x128xf32>
    %c0_6 = arith.constant 0 : index
    %c0_7 = arith.constant 0 : index
    %8 = vector.load %arg4[%c0_6, %c0_7] : memref<128x128xf32, #tpu.memory_space<vmem>>, vector<128x128xf32>
    %cst_8 = arith.constant dense<0.000000e+00> : vector<8x128xf32>
    %9 = tpu.matmul %7, %8, %cst_8 {dimension_numbers = #tpu.dot_dimension_numbers<[1], [0], [0], [1], [0, 0, 1, 1], [], []>} : vector<8x128xf32>, vector<128x128xf32>, vector<8x128xf32> -> vector<8x128xf32>
    %c0_9 = arith.constant 0 : index
    %c0_10 = arith.constant 0 : index
    %10 = vector.load %arg5[%c0_9, %c0_10] : memref<1x128xf32, #tpu.memory_space<vmem>>, vector<1x128xf32>
    %11 = vector.broadcast %10 : vector<1x128xf32> to vector<8x128xf32>
    %12 = arith.addf %9, %11 : vector<8x128xf32>
    %cst_11 = arith.constant 0.000000e+00 : f32
    %13 = vector.broadcast %cst_11 : f32 to vector<8x128xf32>
    %14 = arith.maximumf %12, %13 : vector<8x128xf32>
    %c0_12 = arith.constant 0 : index
    %c0_13 = arith.constant 0 : index
    %15 = vector.load %arg6[%c0_12, %c0_13] : memref<128x4xf32, #tpu.memory_space<vmem>>, vector<128x4xf32>
    %cst_14 = arith.constant dense<0.000000e+00> : vector<8x4xf32>
    %16 = tpu.matmul %14, %15, %cst_14 {dimension_numbers = #tpu.dot_dimension_numbers<[1], [0], [0], [1], [0, 0, 1, 1], [], []>} : vector<8x128xf32>, vector<128x4xf32>, vector<8x4xf32> -> vector<8x4xf32>
    %c0_15 = arith.constant 0 : index
    %c0_16 = arith.constant 0 : index
    %17 = vector.load %arg7[%c0_15, %c0_16] : memref<1x4xf32, #tpu.memory_space<vmem>>, vector<1x4xf32>
    %18 = vector.broadcast %17 : vector<1x4xf32> to vector<8x4xf32>
    %19 = arith.addf %16, %18 : vector<8x4xf32>
    %c0_17 = arith.constant 0 : index
    %c0_18 = arith.constant 0 : index
    %20 = vector.load %arg8[%c0_17, %c0_18] : memref<8x4xf32, #tpu.memory_space<vmem>>, vector<8x4xf32>
    tpu.vector_store %arg8[%c0_17, %c0_18], %19 {strides = array<i32>} : memref<8x4xf32, #tpu.memory_space<vmem>>, vector<8x4xf32>,
    return
  }
  func.func @transform_0(%arg0: i32) -> (i32, i32) {
    %c0_i32 = arith.constant 0 : i32
    %c0_i32_0 = arith.constant 0 : i32
    return %arg0, %c0_i32 : i32, i32
  }
  func.func @transform_1(%arg0: i32) -> (i32, i32) {
    %c0_i32 = arith.constant 0 : i32
    %c0_i32_0 = arith.constant 0 : i32
    %c0_i32_1 = arith.constant 0 : i32
    return %c0_i32, %c0_i32_0 : i32, i32
  }
  func.func @transform_2(%arg0: i32) -> (i32, i32) {
    %c0_i32 = arith.constant 0 : i32
    %c0_i32_0 = arith.constant 0 : i32
    %c0_i32_1 = arith.constant 0 : i32
    return %c0_i32, %c0_i32_0 : i32, i32
  }
  func.func @transform_3(%arg0: i32) -> (i32, i32) {
    %c0_i32 = arith.constant 0 : i32
    %c0_i32_0 = arith.constant 0 : i32
    %c0_i32_1 = arith.constant 0 : i32
    return %c0_i32, %c0_i32_0 : i32, i32
  }
  func.func @transform_4(%arg0: i32) -> (i32, i32) {
    %c0_i32 = arith.constant 0 : i32
    %c0_i32_0 = arith.constant 0 : i32
    %c0_i32_1 = arith.constant 0 : i32
    return %c0_i32, %c0_i32_0 : i32, i32
  }
  func.func @transform_5(%arg0: i32) -> (i32, i32) {
    %c0_i32 = arith.constant 0 : i32
    %c0_i32_0 = arith.constant 0 : i32
    %c0_i32_1 = arith.constant 0 : i32
    return %c0_i32, %c0_i32_0 : i32, i32
  }
  func.func @transform_6(%arg0: i32) -> (i32, i32) {
    %c0_i32 = arith.constant 0 : i32
    %c0_i32_0 = arith.constant 0 : i32
    %c0_i32_1 = arith.constant 0 : i32
    return %c0_i32, %c0_i32_0 : i32, i32
  }
  func.func @transform_7(%arg0: i32) -> (i32, i32) {
    %c0_i32 = arith.constant 0 : i32
    %c0_i32_0 = arith.constant 0 : i32
    return %arg0, %c0_i32 : i32, i32
  }
}

</mosaic_0001>

<bundles_post_ra>
// kernel: cpnet_forward.1
= control target key start
LH: loop header
LB: loop body
LE: loop exit
PB: predicated region body
PF: predicated region fallthrough
CT: control target
= control target key end

     0   :  { %v432_v0 = vmov 0.0   ;;  %vm433_vm0 = vmmov 0   ;;  %vm38_vm1 = vcmask 261120   ;;  %vm300_vm2 = vcmask 31744   ;;  %s639_s1 = inlined_call_operand.vmem [shape: f32[32,128], index: 1, kind: input, shape index: {}]   ;;  %s640_s3 = inlined_call_operand.vmem [shape: f32[128,128], index: 3, kind: input, shape index: {}]   ;;  %s641_s0 = inlined_call_operand.vmem [shape: f32[8,32], index: 0, kind: input, shape index: {}]   ;;  %s642_s5 = inlined_call_operand.vmem [shape: f32[128,4], index: 5, kind: input, shape index: {}]   ;;  %s643_s2 = inlined_call_operand.vmem [shape: f32[1,128], index: 2, kind: input, shape index: {}]   ;;  %s644_s4 = inlined_call_operand.vmem [shape: f32[1,128], index: 4, kind: input, shape index: {}]   ;;  %s645_s6 = inlined_call_operand.vmem [shape: f32[1,4], index: 6, kind: input, shape index: {}]   ;;  %s646_s7 = inlined_call_operand.vmem [shape: f32[8,4], index: 7, kind: output, shape index: {}]  }
   0x1   :  { %349 = vmatprep.subr.mxu0 %v432_v0  ;;  %v30_v1 = vld [vmem:[%s639_s1 + $0x18] sm:$0xff]  ;;  %v29_v2 = vld [vmem:[%s639_s1 + $0x10] sm:$0xff]  ;;  %357 = vmatprep.mubr.msk.f32.mxu0 %vm433_vm0, %v432_v0  ;;  %v28_v4 = vld [vmem:[%s639_s1 + $0x8] sm:$0xff] }
   0x2   :  { %350 = vmatpush3.msra.mxu0 %v30_v1  ;;  %360 = vmatprep.subr.mxu1 %v432_v0  ;;  %v128_v3 = vld [vmem:[%s640_s3 + $0x78] sm:$0xff]  ;;  %v127_v5 = vld [vmem:[%s640_s3 + $0x70] sm:$0xff]  ;;  %v126_v6 = vld [vmem:[%s640_s3 + $0x68] sm:$0xff] }
   0x3   :  { %351 = vmatprep.subr.mxu0 %v432_v0  ;;  %361 = vmatpush3.msra.mxu1 %v128_v3  ;;  %v27_v7 = vld [vmem:[%s639_s1] sm:$0xff]  ;;  %v124_v10 = vld [vmem:[%s640_s3 + $0x58] sm:$0xff]  ;;  %v123_v11 = vld [vmem:[%s640_s3 + $0x50] sm:$0xff] }
   0x4   :  { %352 = vmatpush3.msra.mxu0 %v29_v2  ;;  %362 = vmatprep.subr.mxu1 %v432_v0  ;;  %v26_v8 = vld [vmem:[%s641_s0] sm:$0xff]  ;;  %v122_v12 = vld [vmem:[%s640_s3 + $0x48] sm:$0xff]  ;;  %v120_v14 = vld [vmem:[%s640_s3 + $0x38] sm:$0xff] }
   0x5   :  { %353 = vmatprep.subr.mxu0 %v432_v0  ;;  %363 = vmatpush3.msra.mxu1 %v127_v5  ;;  %v125_v9 = vld [vmem:[%s640_s3 + $0x60] sm:$0xff]  ;;  %v119_v15 = vld [vmem:[%s640_s3 + $0x30] sm:$0xff]  ;;  %v118_v16 = vld [vmem:[%s640_s3 + $0x28] sm:$0xff] }
   0x6   :  { %354 = vmatpush3.msra.mxu0 %v28_v4  ;;  %364 = vmatprep.subr.mxu1 %v432_v0  ;;  %v121_v13 = vld [vmem:[%s640_s3 + $0x40] sm:$0xff]  ;;  %v116_v18 = vld [vmem:[%s640_s3 + $0x18] sm:$0xff]  ;;  %v115_v19 = vld [vmem:[%s640_s3 + $0x10] sm:$0xff] }
   0x7   :  { %355 = vmatprep.subr.mxu0 %v432_v0  ;;  %365 = vmatpush3.msra.mxu1 %v126_v6  ;;  %v117_v17 = vld [vmem:[%s640_s3 + $0x20] sm:$0xff]  ;;  %v114_v20 = vld [vmem:[%s640_s3 + $0x8] sm:$0xff]  ;;  %v222_v22 = vld [vmem:[%s642_s5 + $0x78] sm:$0xff] }
   0x8   :  { %356 = vmatpush3.msra.mxu0 %v27_v7  ;;  %366 = vmatprep.subr.mxu1 %v432_v0  ;;  %v113_v21 = vld [vmem:[%s640_s3] sm:$0xff]  ;;  %v221_v23 = vld [vmem:[%s642_s5 + $0x70] sm:$0xff]  ;;  %v220_v24 = vld [vmem:[%s642_s5 + $0x68] sm:$0xff] }
   0x9   :  { %358 = vmatmul.mubr.msk.f32.vlgmr.msra.gmra.mxu0 %vm38_vm1, %v26_v8  ;;  %367 = vmatpush3.msra.mxu1 %v125_v9  ;;  %v219_v25 = vld [vmem:[%s642_s5 + $0x60] sm:$0xff]  ;;  %v218_v26 = vld [vmem:[%s642_s5 + $0x58] sm:$0xff]  ;;  %v217_v27 = vld [vmem:[%s642_s5 + $0x50] sm:$0xff] }
   0xa   :  { %368 = vmatprep.subr.mxu1 %v432_v0  ;;  %392 = vmatprep.mubr.msk.f32.mxu1 %vm433_vm0, %v432_v0  ;;  %v216_v28 = vld [vmem:[%s642_s5 + $0x48] sm:$0xff]  ;;  %v215_v29 = vld [vmem:[%s642_s5 + $0x40] sm:$0xff]  ;;  %v214_v30 = vld [vmem:[%s642_s5 + $0x38] sm:$0xff] }
   0xb   :  { %369 = vmatpush3.msra.mxu1 %v124_v10  ;;  %395 = vmatprep.subr.mxu0 %v432_v0  ;;  %v213_v31 = vld [vmem:[%s642_s5 + $0x30] sm:$0xff]  ;;  %v212_v32 = vld [vmem:[%s642_s5 + $0x28] sm:$0xff]  ;;  %v211_v33 = vld [vmem:[%s642_s5 + $0x20] sm:$0xff] }
   0xc   :  { %370 = vmatprep.subr.mxu1 %v432_v0  ;;  %427 = vmatprep.mubr.msk.f32.mxu0 %vm433_vm0, %v432_v0  ;;  %v210_v34 = vld [vmem:[%s642_s5 + $0x18] sm:$0xff]  ;;  %v306_v35 = vld [vmem:[%s643_s2] ss:$0 sm:$0xff]  ;;  %v209_v40 = vld [vmem:[%s642_s5 + $0x10] sm:$0xff] }
   0xd   :  { %371 = vmatpush3.msra.mxu1 %v123_v11  ;;  %396 = vmatpush3.msra.mxu0 %v222_v22  ;;  %v208_v41 = vld [vmem:[%s642_s5 + $0x8] sm:$0xff]  ;;  %v207_v42 = vld [vmem:[%s642_s5] sm:$0xff] }
   0xe   :  { %372 = vmatprep.subr.mxu1 %v432_v0  ;;  %397 = vmatprep.subr.mxu0 %v432_v0  ;;  %v308_v43 = vld [vmem:[%s644_s4] ss:$0 sm:$0xff] }
   0xf   :  { %373 = vmatpush3.msra.mxu1 %v122_v12  ;;  %398 = vmatpush3.msra.mxu0 %v221_v23  ;;  %v309_v48 = vld [vmem:[%s645_s6] ss:$0 sm:$0xff] }
  0x10   :  { %374 = vmatprep.subr.mxu1 %v432_v0  ;;  %399 = vmatprep.subr.mxu0 %v432_v0 }
  0x11   :  { %375 = vmatpush3.msra.mxu1 %v121_v13  ;;  %400 = vmatpush3.msra.mxu0 %v220_v24 }
  0x12   :  { %376 = vmatprep.subr.mxu1 %v432_v0  ;;  %401 = vmatprep.subr.mxu0 %v432_v0 }
  0x13   :  { %377 = vmatpush3.msra.mxu1 %v120_v14  ;;  %402 = vmatpush3.msra.mxu0 %v219_v25 }
  0x14   :  { %378 = vmatprep.subr.mxu1 %v432_v0  ;;  %403 = vmatprep.subr.mxu0 %v432_v0 }
  0x15   :  { %379 = vmatpush3.msra.mxu1 %v119_v15  ;;  %404 = vmatpush3.msra.mxu0 %v218_v26 }
  0x16   :  { %380 = vmatprep.subr.mxu1 %v432_v0  ;;  %405 = vmatprep.subr.mxu0 %v432_v0 }
  0x17   :  { %381 = vmatpush3.msra.mxu1 %v118_v16  ;;  %406 = vmatpush3.msra.mxu0 %v217_v27 }
  0x18   :  { %382 = vmatprep.subr.mxu1 %v432_v0  ;;  %407 = vmatprep.subr.mxu0 %v432_v0 }
  0x19   :  { %383 = vmatpush3.msra.mxu1 %v117_v17  ;;  %408 = vmatpush3.msra.mxu0 %v216_v28 }
  0x1a   :  { %384 = vmatprep.subr.mxu1 %v432_v0  ;;  %409 = vmatprep.subr.mxu0 %v432_v0 }
  0x1b   :  { %385 = vmatpush3.msra.mxu1 %v116_v18  ;;  %410 = vmatpush3.msra.mxu0 %v215_v29 }
  0x1c   :  { %386 = vmatprep.subr.mxu1 %v432_v0  ;;  %411 = vmatprep.subr.mxu0 %v432_v0 }
  0x1d   :  { %387 = vmatpush3.msra.mxu1 %v115_v19  ;;  %412 = vmatpush3.msra.mxu0 %v214_v30 }
  0x1e   :  { %388 = vmatprep.subr.mxu1 %v432_v0  ;;  %413 = vmatprep.subr.mxu0 %v432_v0 }
  0x1f   :  { %389 = vmatpush3.msra.mxu1 %v114_v20  ;;  %414 = vmatpush3.msra.mxu0 %v213_v31 }
  0x20   :  { %390 = vmatprep.subr.mxu1 %v432_v0  ;;  %415 = vmatprep.subr.mxu0 %v432_v0 }
  0x21   :  { %391 = vmatpush3.msra.mxu1 %v113_v21  ;;  %416 = vmatpush3.msra.mxu0 %v212_v32 }
  0x22   :  { %417 = vmatprep.subr.mxu0 %v432_v0 }
  0x23   :  { %418 = vmatpush3.msra.mxu0 %v211_v33 }
  0x24   :  { %419 = vmatprep.subr.mxu0 %v432_v0 }
  0x25   :  { %420 = vmatpush3.msra.mxu0 %v210_v34 }
  0x26   :  { %421 = vmatprep.subr.mxu0 %v432_v0 }
  0x27   :  { %422 = vmatpush3.msra.mxu0 %v209_v40 }
  0x28   :  { %423 = vmatprep.subr.mxu0 %v432_v0 }
  0x29   :  { %424 = vmatpush3.msra.mxu0 %v208_v41 }
  0x2a   :  { %425 = vmatprep.subr.mxu0 %v432_v0 }
  0x2b   :  { %426 = vmatpush3.msra.mxu0 %v207_v42 }
  0xc9   :  { %v108_v36 = vpop.f32.mrf.mxu0 }
  0xca   :  { %v109_v37 = vadd.f32 %v306_v35, %v108_v36 }
  0xcb   :  { %v359_v38 = vpop.f32.mrf.mxu0 }
  0xcc   :  { %v112_v39 = vmax.f32 %v109_v37, 0.0 }
  0xce   :  { %393 = vmatmul.mubr.f32.vlgmr.msra.gmra.mxu1 %v112_v39 }
 0x18e   :  { %v202_v44 = vpop.f32.mrf.mxu1 }
 0x18f   :  { %v203_v45 = vadd.f32 %v308_v43, %v202_v44 }
 0x190   :  { %v394_v46 = vpop.f32.mrf.mxu1 }
 0x191   :  { %v206_v47 = vmax.f32 %v203_v45, 0.0 }
 0x193   :  { %428 = vmatmul.mubr.f32.vlgmr.msra.gmra.mxu0 %v206_v47 }
 0x253   :  { %v296_v49 = vpop.f32.mrf.mxu0 }
 0x254   :  { %v297_v50 = vadd.f32 %v309_v48, %v296_v49 }
 0x255   :  { %v429_v51 = vpop.f32.mrf.mxu0 }
 0x256   :  { %301 = vst.msk [vmem:[%s646_s7] sm:$0xff] %vm300_vm2, %v297_v50 }

</bundles_post_ra>
